<compile_context>
chip_gen: v5e
topology: v5e:2x2
jax: 0.10.0
libtpu: 0.0.40
codegen_flags: <defaults>
</compile_context>

<pallas_src>
import math

import jax
import jax.numpy as jnp
from jax.experimental import pallas as pl
from jax.experimental.pallas import tpu as pltpu

_ALIGN = 128  # lane width; N and F_out are zero-padded to multiples of this.


# --------------------------------------------------------------------------- kernels
def _support_kernel(x_ref, w_ref, s_ref):
    # support tile = X_tile @ W  (f32 inputs, f32 MXU accumulate)
    s_ref[...] = jnp.dot(
        x_ref[...], w_ref[...], preferred_element_type=jnp.float32
    ).astype(s_ref.dtype)


def _aggregate_resident_kernel(adj_ref, s_ref, b_ref, o_ref):
    # out tile = A_row_tile @ support + bias   (A streamed; support / bias resident)
    out = jnp.dot(adj_ref[...], s_ref[...], preferred_element_type=jnp.float32)
    o_ref[...] = (out + b_ref[...]).astype(o_ref.dtype)


def _aggregate_ktiled_kernel(adj_ref, s_ref, b_ref, o_ref, acc_ref):
    # out tile = sum_k A[i, k] @ support[k] + bias   (f32 accumulator in VMEM scratch)
    k = pl.program_id(1)

    @pl.when(k == 0)
    def _():
        acc_ref[...] = jnp.zeros_like(acc_ref)

    acc_ref[...] += jnp.dot(adj_ref[...], s_ref[...],
                            preferred_element_type=jnp.float32)

    @pl.when(k == pl.num_programs(1) - 1)
    def _():
        o_ref[...] = (acc_ref[...] + b_ref[...]).astype(o_ref.dtype)


# --------------------------------------------------------------------------- helpers
def _round_up(x, m):
    return (x + m - 1) // m * m


def _vmem_capacity_bytes():
    try:
        return int(pltpu.get_tpu_info().vmem_capacity_bytes)
    except Exception:
        return 64 * 1024 * 1024  # conservative default (v7x has the smallest VMEM)


def _vmem_limit(need_bytes):
    cap = _vmem_capacity_bytes()
    return int(min(max(need_bytes * 3 // 2 + (4 << 20), 16 << 20), cap * 3 // 4))


def _choose_plan(n_pad, f_out_pad, a_sz, row_tile=None, k_tile=None):
    """Pick (row tile tm, contraction tile tk); tk is None => resident-support path."""
    cap = _vmem_capacity_bytes()
    budget = cap // 2                             # headroom under the scoped limit
    tm_cap = 1024 if cap >= (96 << 20) else 512   # 128 MiB v5e/v6e vs 64 MiB v7x

    # Guarantee >= 2 grid steps per TensorCore (>= 4 total on megacore parts) so the
    # BlockSpec double buffer hides the A DMA and both cores get rows.
    if n_pad >= 4 * _ALIGN:
        target_steps = 4
    elif n_pad >= 2 * _ALIGN:
        target_steps = 2
    else:
        target_steps = 1
    tm_steps_cap = max(n_pad // target_steps, _ALIGN)

    tm_cands = [t for t in (1024, 512, 256, 128)
                if t <= min(tm_cap, tm_steps_cap) and n_pad % t == 0]
    if not tm_cands:
        tm_cands = [min(n_pad, _ALIGN)]
    tk_cands = [t for t in (2048, 1024, 512, 256, 128) if n_pad % t == 0]
    if not tk_cands:
        tk_cands = [n_pad]

    def resident_need(tm):
        return (2 * tm * n_pad * a_sz            # A row tiles (double buffered)
                + 2 * n_pad * f_out_pad * a_sz   # resident support (x2: default pipeline)
                + 2 * f_out_pad * 4              # bias
                + 2 * tm * f_out_pad * 4)        # output tiles

    def ktiled_need(tm, tk):
        return (2 * tm * tk * a_sz               # A tiles
                + 2 * tk * f_out_pad * a_sz      # support tiles
                + 2 * f_out_pad * 4              # bias
                + 2 * tm * f_out_pad * 4         # output tiles
                + tm * f_out_pad * 4)            # f32 accumulator scratch

    if row_tile is not None and k_tile is not None:
        return int(row_tile), int(k_tile)
    if row_tile is not None:
        tm = int(row_tile)
        if resident_need(tm) <= budget:
            return tm, None
        for tk in tk_cands:
            if ktiled_need(tm, tk) <= budget:
                return tm, tk
        return tm, tk_cands[-1]
    if k_tile is not None:
        tk = int(k_tile)
        for tm in tm_cands:
            if ktiled_need(tm, tk) <= budget:
                return tm, tk
        return tm_cands[-1], tk
    for tm in tm_cands:                           # prefer resident: minimal HBM traffic
        if resident_need(tm) <= budget:
            return tm, None
    for tm in tm_cands:                           # fall back: bounded-VMEM K tiling
        for tk in tk_cands:
            if ktiled_need(tm, tk) <= budget:
                return tm, tk
    return tm_cands[-1], tk_cands[-1]


def prepare_adjacency(adj, *, compute_dtype=jnp.bfloat16):
    """Cast + zero-pad the dense adjacency once.

    Kernel 2 is HBM-bound on A, so re-casting/padding A inside every forward call
    adds a full extra N^2 read+write.  Call this once per graph and reuse the result
    across layers / steps; graph_convolution() accepts either the raw (n, n) matrix
    or this prepared (n_pad, n_pad) version and skips the extra pass for the latter.
    """
    n = adj.shape[0]
    n_pad = _round_up(max(n, 1), _ALIGN)
    if adj.dtype != jnp.dtype(compute_dtype):
        adj = adj.astype(compute_dtype)
    if n_pad != n:
        adj = jnp.pad(adj, ((0, n_pad - n), (0, n_pad - n)))
    return adj


# --------------------------------------------------------------------------- wrapper
def graph_convolution(x, weight, adj, bias=None, *, compute_dtype=jnp.bfloat16,
                      row_tile=None, k_tile=None):
    """Forward pass of the GCN layer: adj @ (x @ weight) + bias."""
    n, f_in = x.shape
    f_out = weight.shape[1]
    compute_dtype = jnp.dtype(compute_dtype)
    a_sz = compute_dtype.itemsize

    n_pad = _round_up(max(n, 1), _ALIGN)
    f_out_pad = _round_up(max(f_out, 1), _ALIGN)

    # Adjacency: use a pre-prepared (cast + padded) copy as-is when given.
    if adj.shape == (n_pad, n_pad) and adj.dtype == compute_dtype:
        ad = adj
    else:
        assert adj.shape == (n, n), \
            f"adj must be ({n},{n}) raw or ({n_pad},{n_pad}) prepared"
        ad = prepare_adjacency(adj, compute_dtype=compute_dtype)

    # x / weight stay f32: kernel 1 is tiny, and keeping them unrounded means the
    # bf16 path only rounds A and the finished support at kernel 2's MXU input.
    xd = x.astype(jnp.float32)
    if n_pad != n:
        xd = jnp.pad(xd, ((0, n_pad - n), (0, 0)))
    wd = weight.astype(jnp.float32)
    if f_out_pad != f_out:
        wd = jnp.pad(wd, ((0, 0), (0, f_out_pad - f_out)))
    if bias is None:
        bd = jnp.zeros((1, f_out_pad), jnp.float32)
    else:
        bd = bias.astype(jnp.float32)
        if f_out_pad != f_out:
            bd = jnp.pad(bd, (0, f_out_pad - f_out))
        bd = bd.reshape(1, f_out_pad)

    tm, tk = _choose_plan(n_pad, f_out_pad, a_sz, row_tile=row_tile, k_tile=k_tile)
    assert tm % _ALIGN == 0 and n_pad % tm == 0, f"bad row_tile {tm} for n_pad {n_pad}"
    if tk is not None:
        assert tk % _ALIGN == 0 and n_pad % tk == 0, f"bad k_tile {tk} for n_pad {n_pad}"
    num_row_tiles = n_pad // tm

    # ---- kernel 1: support = X @ W  (f32, computed once, lane-dense 128-padded) ----
    need1 = 2 * tm * f_in * 4 + 2 * f_in * f_out_pad * 4 + 2 * tm * f_out_pad * 4
    support = pl.pallas_call(
        _support_kernel,
        out_shape=jax.ShapeDtypeStruct((n_pad, f_out_pad), jnp.float32),
        grid=(num_row_tiles,),
        in_specs=[
            pl.BlockSpec((tm, f_in), lambda i: (i, 0)),
            pl.BlockSpec((f_in, f_out_pad), lambda i: (0, 0)),
        ],
        out_specs=pl.BlockSpec((tm, f_out_pad), lambda i: (i, 0)),
        compiler_params=pltpu.CompilerParams(
            dimension_semantics=("parallel",),
            vmem_limit_bytes=_vmem_limit(need1),
        ),
        cost_estimate=pl.CostEstimate(
            flops=2 * n_pad * f_in * f_out_pad,
            transcendentals=0,
            bytes_accessed=(n_pad * f_in + f_in * f_out_pad + n_pad * f_out_pad) * 4,
        ),
    )(xd, wd)

    # Hand support to the aggregation kernel in the streaming dtype (one O(N*128)
    # cast — negligible next to the O(N^2) adjacency read; support itself was
    # accumulated in full f32 from unrounded x / W).
    sup = support if compute_dtype == jnp.float32 else support.astype(compute_dtype)

    # ---- kernel 2: out = A @ support + bias  (A streamed; HBM-bound on A) ----
    flops2 = 2 * n_pad * n_pad * f_out_pad
    if tk is None:
        # Resident-support path: only A moves per grid step.
        need2 = (2 * tm * n_pad * a_sz + 2 * n_pad * f_out_pad * a_sz
                 + 2 * f_out_pad * 4 + 2 * tm * f_out_pad * 4)
        out_pad = pl.pallas_call(
            _aggregate_resident_kernel,
            out_shape=jax.ShapeDtypeStruct((n_pad, f_out_pad), jnp.float32),
            grid=(num_row_tiles,),
            in_specs=[
                pl.BlockSpec((tm, n_pad), lambda i: (i, 0)),          # A: streamed
                pl.BlockSpec((n_pad, f_out_pad), lambda i: (0, 0)),   # support: resident
                pl.BlockSpec((1, f_out_pad), lambda i: (0, 0)),       # bias: resident
            ],
            out_specs=pl.BlockSpec((tm, f_out_pad), lambda i: (i, 0)),
            compiler_params=pltpu.CompilerParams(
                dimension_semantics=("parallel",),
                vmem_limit_bytes=_vmem_limit(need2),
            ),
            cost_estimate=pl.CostEstimate(
                flops=flops2,
                transcendentals=0,
                bytes_accessed=n_pad * n_pad * a_sz
                               + n_pad * f_out_pad * (a_sz + 4)
                               + f_out_pad * 4,
            ),
        )(ad, sup, bd)
    else:
        # K-tiled path: contraction dim on an "arbitrary" grid axis with an f32 VMEM
        # accumulator; VMEM use is bounded independent of N (needed on 64 MiB v7x).
        num_k_tiles = n_pad // tk
        need2 = (2 * tm * tk * a_sz + 2 * tk * f_out_pad * a_sz
                 + 2 * f_out_pad * 4 + 2 * tm * f_out_pad * 4 + tm * f_out_pad * 4)
        out_pad = pl.pallas_call(
            _aggregate_ktiled_kernel,
            out_shape=jax.ShapeDtypeStruct((n_pad, f_out_pad), jnp.float32),
            grid=(num_row_tiles, num_k_tiles),
            in_specs=[
                pl.BlockSpec((tm, tk), lambda i, k: (i, k)),           # A tile
                pl.BlockSpec((tk, f_out_pad), lambda i, k: (k, 0)),    # support tile
                pl.BlockSpec((1, f_out_pad), lambda i, k: (0, 0)),     # bias
            ],
            out_specs=pl.BlockSpec((tm, f_out_pad), lambda i, k: (i, 0)),
            scratch_shapes=[pltpu.VMEM((tm, f_out_pad), jnp.float32)],
            compiler_params=pltpu.CompilerParams(
                dimension_semantics=("parallel", "arbitrary"),
                vmem_limit_bytes=_vmem_limit(need2),
            ),
            cost_estimate=pl.CostEstimate(
                flops=flops2,
                transcendentals=0,
                bytes_accessed=n_pad * n_pad * a_sz
                               + num_row_tiles * n_pad * f_out_pad * a_sz
                               + n_pad * f_out_pad * 4 + f_out_pad * 4,
            ),
        )(ad, sup, bd)

    return out_pad[:n, :f_out]


def reference(x, weight, adj, bias):
    support = x @ weight
    out = adj @ support
    return out + bias[None, :] if bias is not None else out


# --------------------------------------------------------------------------- demo
if __name__ == "__main__":
    N = 256        # number of graph nodes
    F_IN = 64      # in_features
    F_OUT = 32     # out_features

    key = jax.random.PRNGKey(0)
    kx, ka, kw, kb = jax.random.split(key, 4)

    x = jax.random.normal(kx, (N, F_IN), dtype=jnp.float32)
    adj = jax.random.uniform(ka, (N, N), dtype=jnp.float32)

    # reset_parameters(): U(-stdv, stdv), stdv = 1/sqrt(out_features)
    stdv = 1.0 / math.sqrt(F_OUT)
    weight = jax.random.uniform(kw, (F_IN, F_OUT), minval=-stdv, maxval=stdv,
                                dtype=jnp.float32)
    bias = jax.random.uniform(kb, (F_OUT,), minval=-stdv, maxval=stdv,
                              dtype=jnp.float32)

    ref = reference(x, weight, adj, bias)

    # f32 path: numerical parity with the PyTorch module (auto tiles -> 2-step grid).
    out_f32 = jax.block_until_ready(
        graph_convolution(x, weight, adj, bias, compute_dtype=jnp.float32))
    assert out_f32.shape == (N, F_OUT)
    assert jnp.allclose(out_f32, ref, atol=1e-3, rtol=1e-3), "f32 mismatch vs reference"

    # Default bf16-streamed path with the adjacency prepared ONCE (hoisted cast+pad,
    # cached across layers/steps).  x / W / support matmul stay f32, so tolerance is
    # tighter than before.
    adj_bf16 = prepare_adjacency(adj, compute_dtype=jnp.bfloat16)
    out_bf16 = jax.block_until_ready(
        graph_convolution(x, weight, adj_bf16, bias))
    assert jnp.allclose(out_bf16, ref, atol=0.2, rtol=1e-2), "bf16 mismatch vs reference"

    # K-tiled accumulation path (the bounded-VMEM variant used for large graphs on
    # v7x), exercised here with forced small tiles, bias=None.
    out_kt = jax.block_until_ready(
        graph_convolution(x, weight, adj, bias=None,
                          compute_dtype=jnp.float32, row_tile=128, k_tile=128))
    assert jnp.allclose(out_kt, reference(x, weight, adj, None),
                        atol=1e-3, rtol=1e-3), "k-tiled mismatch vs reference"

    print("KERNEL_OK")
</pallas_src>

<mosaic_0001>
module attributes {stable_mosaic.version = 11 : i64} {
  func.func @_support_kernel(%arg0: i32, %arg1: memref<128x64xf32, #tpu.memory_space<vmem>>, %arg2: memref<64x128xf32, #tpu.memory_space<vmem>>, %arg3: memref<128x128xf32, #tpu.memory_space<vmem>>) attributes {dimension_semantics = [#tpu.dimension_semantics<parallel>], iteration_bounds = array<i64: 2>, scalar_prefetch = 0 : i64, scratch_operands = 0 : i64, tpu.core_type = #tpu.core_type<tc>, window_params = [{transform_indices = @transform_0, window_bounds = array<i64: 128, 64>}, {pipeline_mode = #tpu.pipeline_mode<synchronous>, transform_indices = @transform_1, window_bounds = array<i64: 64, 128>}, {transform_indices = @transform_2, window_bounds = array<i64: 128, 128>}]} {
    %c0 = arith.constant 0 : index
    %c0_0 = arith.constant 0 : index
    %0 = vector.load %arg1[%c0, %c0_0] : memref<128x64xf32, #tpu.memory_space<vmem>>, vector<128x64xf32>
    %c0_1 = arith.constant 0 : index
    %c0_2 = arith.constant 0 : index
    %1 = vector.load %arg2[%c0_1, %c0_2] : memref<64x128xf32, #tpu.memory_space<vmem>>, vector<64x128xf32>
    %cst = arith.constant dense<0.000000e+00> : vector<128x128xf32>
    %2 = tpu.matmul %0, %1, %cst {dimension_numbers = #tpu.dot_dimension_numbers<[1], [0], [0], [1], [0, 0, 1, 1], [], []>} : vector<128x64xf32>, vector<64x128xf32>, vector<128x128xf32> -> vector<128x128xf32>
    %c0_3 = arith.constant 0 : index
    %c0_4 = arith.constant 0 : index
    %3 = vector.load %arg3[%c0_3, %c0_4] : memref<128x128xf32, #tpu.memory_space<vmem>>, vector<128x128xf32>
    tpu.vector_store %arg3[%c0_3, %c0_4], %2 {strides = array<i32>} : memref<128x128xf32, #tpu.memory_space<vmem>>, vector<128x128xf32>,
    return
  }
  func.func @transform_0(%arg0: i32) -> (i32, i32) {
    %c0_i32 = arith.constant 0 : i32
    %c0_i32_0 = arith.constant 0 : i32
    return %arg0, %c0_i32 : i32, i32
  }
  func.func @transform_1(%arg0: i32) -> (i32, i32) {
    %c0_i32 = arith.constant 0 : i32
    %c0_i32_0 = arith.constant 0 : i32
    %c0_i32_1 = arith.constant 0 : i32
    return %c0_i32, %c0_i32_0 : i32, i32
  }
  func.func @transform_2(%arg0: i32) -> (i32, i32) {
    %c0_i32 = arith.constant 0 : i32
    %c0_i32_0 = arith.constant 0 : i32
    return %arg0, %c0_i32 : i32, i32
  }
}

</mosaic_0001>

<bundles_post_ra>
// kernel: tpu_custom_call.1
= control target key start
LH: loop header
LB: loop body
LE: loop exit
PB: predicated region body
PF: predicated region fallthrough
CT: control target
= control target key end

     0   :  { %7 = vsyncpa [#allocation3], 0  ;;  %s717_s0 = inlined_call_operand.vmem [shape: f32[256,64], index: 0, kind: input, shape index: {}]   ;;  %s718_s1 = inlined_call_operand.vmem [shape: f32[64,128], index: 1, kind: input, shape index: {}]   ;;  %s719_s2 = inlined_call_operand.hbm [shape: f32[256,128], index: 2, kind: output, shape index: {}]  }
   0x1   :  { %9 = vsyncpa [#allocation3 + $0x1], 0  ;;  %s552_s9 = smov 0   ;;  %s554_s10 = smov 0  }
   0x2   :  { %s556_s11 = smov 0   ;;  %s558_s12 = smov 0  }
   0x3 LB: > { %s573_s13 = sadd.s32 4294967295, %s533_s12   ;;  %s377_s14 = sadd.s32 4294967294, %s533_s12   ;;  %s533_s12 = sphi %s558_s12, %s725_s12   ;;  %s529_s11 = sphi %s556_s11, %s724_s11   ;;  %s525_s10 = sphi %s554_s10, %s723_s10   ;;  %s521_s9 = sphi %s552_s9, %s722_s9  }
   0x4   : > { %s577_s15 = sadd.s32 1, %s533_s12   ;;  %s69_s16 = sadd.s32 1, %s529_s11 }
   0x5   : > { %s66_s17 = ssub.s32 %s533_s12, %s577_s15  ;;  %p79_p0 = scmp.ne.s32.totalorder %s529_s11, %s525_s10 }
   0x6   : > { %p67_p1 = scmp.eq.s32.totalorder %s66_s17, 0  ;;  %p80_p2 = scmp.eq.s32.totalorder %s573_s13, 1 }
   0x7   : > { %p85_p3 = scmp.ne.s32.totalorder %s525_s10, %s521_s9  ;;  %p86_p4 = scmp.eq.s32.totalorder %s377_s14, 1 }
   0x8   : > { %s588_s18 = scalar_select %p67_p1, %s529_s11, %s69_s16  }
   0x9   : > { %p590_p5 = por %p80_p2, %p79_p0  ;;  %p594_p6 = por %p86_p4, %p85_p3 }
   0xa   : > { %p380_p7 = scmp.ge.s32.totalorder %s533_s12, 1  ;;  %p116_p8 = scmp.lt.s32.totalorder %s533_s12, 3 }
   0xc   : > { %p117_p9 = pnand %p380_p7, %p116_p8 }
   0xd   : > { %s382_s25 = sshll.u32 (!%p117_p9), %s573_s13, 4  ;;  %s135_s23 = sand.u32 (!%p117_p9), 1, %s525_s10  }
   0xe   : > { %120 = sbr.rel (%p117_p9) target bundleno = 196 (0xc4), region = 28  ;;  %p139_p10 = scmp.lt.s32.totalorder (!%p117_p9), %s382_s25, 31 }
   0xf   : > { %s381_s24 = sshll.u32 (!%p117_p9), %s135_s23, 7  ;;  %s405_s26 = sshll.u32 (!%p117_p9), %s573_s13, 7 }
  0x10   : > { %s311_s29 = scalar_lea.hbm (!%p117_p9), %s719_s2, %s405_s26  ;;  %s300_s13 = scalar_lea.sflag (!%p117_p9), [#allocation3], %s135_s23 }
  0x11   : > { %s314_s3 = sshll.u32 (!%p117_p9), %s311_s29, 4  ;;  %s491_s8 = scalar_lea.hbm (!%p117_p9), %s719_s2, 256  ;;  %s315_s3 = int_to_ptr.hbm [resolvable:$true] %s314_s3 }
  0x13   : > { %v168_v0 = vld [vmem:[%s718_s1 + $0x38] sm:$0xff]  ;;  %v167_v1 = vld [vmem:[%s718_s1 + $0x30] sm:$0xff]  ;;  %v166_v2 = vld [vmem:[%s718_s1 + $0x28] sm:$0xff]  ;;  %s727_s25 = smov (!%p139_p10, %s382_s25), 31  ;;  %vm169_vm0 = vcmask 523264  }
  0x14   : > { %407 = vmatpush.msra.mxu2 %v168_v0  ;;  %408 = vmatpush.msra.mxu3 %v168_v0  ;;  %v165_v3 = vld [vmem:[%s718_s1 + $0x20] sm:$0xff]  ;;  %v164_v4 = vld [vmem:[%s718_s1 + $0x18] sm:$0xff]  ;;  %s383_s4 = sshll.u32 %s727_s25, 3  ;;  %v163_v5 = vld [vmem:[%s718_s1 + $0x10] sm:$0xff]  ;;  %s665_s25 = scalar_lea.vmem [#allocation2], %s381_s24 }
  0x15   : > { %226 = vmatpush.msra.mxu0 %v168_v0  ;;  %406 = vmatpush.msra.mxu1 %v168_v0  ;;  %v162_v6 = vld [vmem:[%s718_s1 + $0x8] sm:$0xff]  ;;  %s625_s17 = scalar_lea.vmem %s717_s0, %s383_s4  ;;  %v161_v7 = vld [vmem:[%s718_s1] sm:$0xff]  ;;  %s312_s30 = sshll.u32 %s665_s25, 4  ;;  %s313_s30 = int_to_ptr.vmem [resolvable:$true] %s312_s30 }
  0x16   : > { %410 = vmatpush.msra.mxu2 %v167_v1  ;;  %411 = vmatpush.msra.mxu3 %v167_v1  ;;  %v153_v8 = vld [vmem:[%s625_s17 + $0x40] sm:$0xff]  ;;  %v154_v12 = vld [vmem:[%s625_s17 + $0x48] sm:$0xff]  ;;  %v155_v16 = vld [vmem:[%s625_s17 + $0x50] sm:$0xff]  ;;  %s485_s4 = sshra.s32 %s315_s3, 4  ;;  %s486_s4 = int_to_ptr.hbm [resolvable:$true] %s485_s4 }
  0x17   : > { %227 = vmatpush.msra.mxu0 %v167_v1  ;;  %409 = vmatpush.msra.mxu1 %v167_v1  ;;  %v157_v9 = vld [vmem:[%s625_s17 + $0x60] sm:$0xff]  ;;  %v158_v13 = vld [vmem:[%s625_s17 + $0x68] sm:$0xff]  ;;  %v159_v17 = vld [vmem:[%s625_s17 + $0x70] sm:$0xff]  ;;  %s487_s5 = scalar_lea.hbm %s486_s4, 128  ;;  %p492_p0 = scmp.lt.s32.totalorder %s486_s4, %s719_s2 }
  0x18   : > { %413 = vmatpush.msra.mxu2 %v166_v2  ;;  %414 = vmatpush.msra.mxu3 %v166_v2  ;;  %v145_v10 = vld [vmem:[%s625_s17] sm:$0xff]  ;;  %v146_v14 = vld [vmem:[%s625_s17 + $0x8] sm:$0xff]  ;;  %v147_v18 = vld [vmem:[%s625_s17 + $0x10] sm:$0xff]  ;;  %p488_p11 = scmp.ne.s32.totalorder %s486_s4, %s487_s5  ;;  %p493_p1 = scmp.lt.s32.totalorder %s491_s8, %s487_s5 }
  0x19   : > { %228 = vmatpush.msra.mxu0 %v166_v2  ;;  %412 = vmatpush.msra.mxu1 %v166_v2  ;;  %v149_v11 = vld [vmem:[%s625_s17 + $0x20] sm:$0xff]  ;;  %v150_v15 = vld [vmem:[%s625_s17 + $0x28] sm:$0xff]  ;;  %v151_v19 = vld [vmem:[%s625_s17 + $0x30] sm:$0xff] }
  0x1a   : > { %416 = vmatpush.msra.mxu2 %v165_v3  ;;  %417 = vmatpush.msra.mxu3 %v165_v3  ;;  %v156_v20 = vld [vmem:[%s625_s17 + $0x58] sm:$0xff]  ;;  %p489_p12 = pnand %p488_p11, %p590_p5  ;;  %p494_p2 = por %p493_p1, %p492_p0 }
  0x1b   : > { %229 = vmatpush.msra.mxu0 %v165_v3  ;;  %415 = vmatpush.msra.mxu1 %v165_v3  ;;  %v160_v21 = vld [vmem:[%s625_s17 + $0x78] sm:$0xff] }
  0x1c   : > { %419 = vmatpush.msra.mxu2 %v164_v4  ;;  %420 = vmatpush.msra.mxu3 %v164_v4  ;;  %v148_v22 = vld [vmem:[%s625_s17 + $0x18] sm:$0xff]  ;;  %p490_p13 = pneg %p489_p12 }
  0x1d   : > { %230 = vmatpush.msra.mxu0 %v164_v4  ;;  %418 = vmatpush.msra.mxu1 %v164_v4  ;;  %v152_v23 = vld [vmem:[%s625_s17 + $0x38] sm:$0xff] }
  0x1e   : > { %422 = vmatpush.msra.mxu2 %v163_v5  ;;  %423 = vmatpush.msra.mxu3 %v163_v5  ;;  %p495_p3 = pnand %p494_p2, %p490_p13 }
  0x1f   : > { %231 = vmatpush.msra.mxu0 %v163_v5  ;;  %421 = vmatpush.msra.mxu1 %v163_v5 }
  0x20   : > { %425 = vmatpush.msra.mxu2 %v162_v6  ;;  %426 = vmatpush.msra.mxu3 %v162_v6 }
  0x21   : > { %232 = vmatpush.msra.mxu0 %v162_v6  ;;  %424 = vmatpush.msra.mxu1 %v162_v6 }
  0x22   : > { %428 = vmatpush.msra.mxu2 %v161_v7  ;;  %429 = vmatpush.msra.mxu3 %v161_v7 }
  0x23   : > { %392 = vmatmul.msk.f32.vlgmr.msra.gmra.mxu2 %vm169_vm0, %v153_v8  ;;  %396 = vmatmul.msk.f32.vlgmr.msra.gmra.mxu3 %vm169_vm0, %v157_v9 }
  0x24   : > { %233 = vmatpush.msra.mxu0 %v161_v7  ;;  %427 = vmatpush.msra.mxu1 %v161_v7 }
  0x25   : > { %384 = vmatmul.msk.f32.vlgmr.msra.gmra.mxu0 %vm169_vm0, %v145_v10  ;;  %388 = vmatmul.msk.f32.vlgmr.msra.gmra.mxu1 %vm169_vm0, %v149_v11 }
  0x2b   : > { %393 = vmatmul.msk.f32.gmra.mxu2 %vm169_vm0, %v154_v12  ;;  %397 = vmatmul.msk.f32.gmra.mxu3 %vm169_vm0, %v158_v13 }
  0x2d   : > { %385 = vmatmul.msk.f32.gmra.mxu0 %vm169_vm0, %v146_v14  ;;  %389 = vmatmul.msk.f32.gmra.mxu1 %vm169_vm0, %v150_v15 }
  0x33   : > { %394 = vmatmul.msk.f32.gmra.mxu2 %vm169_vm0, %v155_v16  ;;  %398 = vmatmul.msk.f32.gmra.mxu3 %vm169_vm0, %v159_v17 }
  0x35   : > { %386 = vmatmul.msk.f32.gmra.mxu0 %vm169_vm0, %v147_v18  ;;  %390 = vmatmul.msk.f32.gmra.mxu1 %vm169_vm0, %v151_v19 }
  0x3b   : > { %395 = vmatmul.msk.f32.gmra.mxu2 %vm169_vm0, %v156_v20  ;;  %399 = vmatmul.msk.f32.gmra.mxu3 %vm169_vm0, %v160_v21 }
  0x3d   : > { %387 = vmatmul.msk.f32.gmra.mxu0 %vm169_vm0, %v148_v22  ;;  %391 = vmatmul.msk.f32.gmra.mxu1 %vm169_vm0, %v152_v23 }
  0xa2   : > { %v235_v24 = vpop.f32.mrf.mxu0  ;;  %v247_v25 = vpop.f32.mrf.mxu1 }
  0xa3   : > { %283 = vst [vmem:[%s665_s25] sm:$0xff] %v235_v24 }
  0xa4   : > { %287 = vst [vmem:[%s665_s25 + $0x20] sm:$0xff] %v247_v25 }
  0xa6   : > { %v259_v26 = vpop.f32.mrf.mxu2  ;;  %v271_v27 = vpop.f32.mrf.mxu3 }
  0xa7   : > { %291 = vst [vmem:[%s665_s25 + $0x40] sm:$0xff] %v259_v26 }
  0xa8   : > { %295 = vst [vmem:[%s665_s25 + $0x60] sm:$0xff] %v271_v27 }
  0xaa   : > { %v238_v28 = vpop.f32.mrf.mxu0  ;;  %v250_v29 = vpop.f32.mrf.mxu1 }
  0xab   : > { %284 = vst [vmem:[%s665_s25 + $0x8] sm:$0xff] %v238_v28 }
  0xac   : > { %288 = vst [vmem:[%s665_s25 + $0x28] sm:$0xff] %v250_v29 }
  0xae   : > { %v262_v30 = vpop.f32.mrf.mxu2  ;;  %v274_v31 = vpop.f32.mrf.mxu3 }
  0xaf   : > { %292 = vst [vmem:[%s665_s25 + $0x48] sm:$0xff] %v262_v30 }
  0xb0   : > { %296 = vst [vmem:[%s665_s25 + $0x68] sm:$0xff] %v274_v31 }
  0xb2   : > { %v241_v32 = vpop.f32.mrf.mxu0  ;;  %v253_v33 = vpop.f32.mrf.mxu1 }
  0xb3   : > { %285 = vst [vmem:[%s665_s25 + $0x10] sm:$0xff] %v241_v32 }
  0xb4   : > { %289 = vst [vmem:[%s665_s25 + $0x30] sm:$0xff] %v253_v33 }
  0xb6   : > { %v265_v34 = vpop.f32.mrf.mxu2  ;;  %v277_v35 = vpop.f32.mrf.mxu3 }
  0xb7   : > { %293 = vst [vmem:[%s665_s25 + $0x50] sm:$0xff] %v265_v34 }
  0xb8   : > { %297 = vst [vmem:[%s665_s25 + $0x70] sm:$0xff] %v277_v35 }
  0xba   : > { %v244_v36 = vpop.f32.mrf.mxu0  ;;  %v256_v37 = vpop.f32.mrf.mxu1 }
  0xbb   : > { %286 = vst [vmem:[%s665_s25 + $0x18] sm:$0xff] %v244_v36 }
  0xbc   : > { %290 = vst [vmem:[%s665_s25 + $0x38] sm:$0xff] %v256_v37 }
  0xbe   : > { %v268_v38 = vpop.f32.mrf.mxu2  ;;  %v280_v39 = vpop.f32.mrf.mxu3 }
  0xbf   : > { %294 = vst [vmem:[%s665_s25 + $0x58] sm:$0xff] %v268_v38 }
  0xc0   : > { %298 = vst [vmem:[%s665_s25 + $0x78] sm:$0xff] %v280_v39 }
  0xc1   : > { %498 = shalt.err (!%p495_p3)
}
  0xc2   : > { %s535_s17 = smov 128   ;;  %s536_s21 = smov 8  }
  0xc3   : > { %430 = dma.vmem_to_hbm [thread:$0]  (%p590_p5), %s313_s30, 2048, %s315_s3, %s300_s13, %s535_s17, %s535_s17, %s536_s21  }
  0xc4 PF: > { %p436_p4 = scmp.ge.s32.totalorder %s533_s12, 2  ;;  %s329_s22 = sand.u32 1, %s521_s9  }
  0xc5   : > { %s330_s23 = scalar_lea.sflag [#allocation3], %s329_s22 }
  0xc6   : > { %p433_p7 = pnand %p436_p4, %p594_p6 }
  0xc8   : > { %p434_p8 = pneg %p433_p7 }
  0xca   : > { %516 = dma.done.wait (%p434_p8), %s330_s23, 2048  }
  0xcb   : > { %518 = vsyncadd (%p434_p8), %s330_s23, 4294965248  ;;  %p12_p9 = scmp.ge.s32.totalorder %s577_s15, 4   ;;  %s722_s9 = smov %s525_s10 }
  0xcc   : > { %s723_s10 = smov %s529_s11  ;;  %s724_s11 = smov %s588_s18 }
  0xcd   : > { %s725_s12 = smov %s577_s15  ;;  %14 = sbr.rel (!%p12_p9) target bundleno = 3 (0x3), region = 63 }
  0xd2   :  { %336 = vsyncpa [#allocation3], 1 }
  0xd3   :  { %338 = vsyncpa [#allocation3 + $0x1], 1 }

</bundles_post_ra>
